<compile_context>
chip_gen: v7x
topology: tpu7x:2x2x1
jax: 0.10.0
libtpu: 0.0.40
codegen_flags: <defaults>
</compile_context>

<pallas_src>
import functools
import math

import jax
import jax.numpy as jnp
from jax.experimental import pallas as pl
from jax.experimental.pallas import tpu as pltpu


def _conv_fold_kernel(xa_ref, xb_ref, w_ref, b_ref, o_ref, p_buf,
                      *, shifts, cin, lanes):
    # xa_ref: (Cin, L)       flattened row-block r of the (padded) image
    # xb_ref: (Cin, L)       flattened row-block r+1 (halo rows for bottom taps)
    # w_ref : (Cout, KK*Cin) tap-folded weights ((kh, kw) major, cin minor)
    # b_ref : (Cout, 1)      bias (f32)
    # o_ref : (Cout, L)      output columns, flattened (oh_local * W + ow)
    # p_buf : (KK*Cin, L)    scratch patch matrix (fully rewritten each step)
    for t, s in enumerate(shifts):            # static unroll over the KH*KW taps
        lo = t * cin
        if s == 0:
            p_buf[lo:lo + cin, :] = xa_ref[...]
        elif s < lanes:
            p_buf[lo:lo + cin, :lanes - s] = xa_ref[:, s:]
            p_buf[lo:lo + cin, lanes - s:] = xb_ref[:, :s]
        else:                                  # s == lanes (only if KW == 1)
            p_buf[lo:lo + cin, :] = xb_ref[...]
    # single K = KH*KW*Cin contraction on the MXU, f32 accumulation
    acc = jnp.dot(w_ref[...], p_buf[...].astype(w_ref.dtype),
                  preferred_element_type=jnp.float32)
    o_ref[...] = (acc + b_ref[...]).astype(o_ref.dtype)


@functools.partial(jax.jit, static_argnames=("padding", "row_tile", "mxu_dtype"))
def conv2d_pallas(x_nchw, weight_oihw, bias, padding=0, *, row_tile=None,
                  mxu_dtype=None):
    """Forward of nn.Conv2d(Cin, Cout, K, padding=padding) (stride 1, groups 1)."""
    N, Cin, H0, W0 = x_nchw.shape
    Cout, Cin_w, KH, KW = weight_oihw.shape
    assert Cin_w == Cin

    H, W = H0 + 2 * padding, W0 + 2 * padding
    Ho, Wo = H - KH + 1, W - KW + 1
    KK = KH * KW
    KKC = KK * Cin

    # ---- row tiling: L = R*W output columns per grid step, L % 128 == 0 ----
    r_unit = 128 // math.gcd(W, 128)
    if row_tile is None:
        row_tile = max(1, 512 // W)                      # aim ~512 lanes / tile
    R = max(r_unit, (row_tile // r_unit) * r_unit)
    R = min(R, r_unit * pl.cdiv(Ho, r_unit))             # don't exceed Ho
    rmin = pl.cdiv((KH - 1) * W + KW - 1, W)             # halo must fit in a tile
    R = max(R, r_unit * pl.cdiv(rmin, r_unit))
    L = R * W
    n_rt = pl.cdiv(Ho, R)

    # ---- single pad (conv zero pad + bottom rows so block r+1 always exists)
    rows_needed = (n_rt + 1) * R
    x_p = jnp.pad(x_nchw, ((0, 0), (0, 0),
                           (padding, rows_needed - H0 - padding),
                           (padding, padding)))
    # contiguous (free) reshape: flattened row blocks of L = R*W lanes
    x_flat = x_p.reshape(N, Cin, rows_needed * W)

    # ---- tap-folded weights / bias ----------------------------------------
    w_mat = jnp.transpose(weight_oihw, (0, 2, 3, 1)).reshape(Cout, KKC)
    if mxu_dtype is not None:                 # bf16 MXU path for v6e / v7x
        w_mat = w_mat.astype(mxu_dtype)
    b_mat = bias.reshape(Cout, 1).astype(jnp.float32)

    shifts = tuple(kh * W + kw for kh in range(KH) for kw in range(KW))

    out_dtype = x_nchw.dtype
    isz = jnp.dtype(out_dtype).itemsize
    wsz = jnp.dtype(w_mat.dtype).itemsize
    # double-buffered operand blocks + scratch, with headroom; capped for v7x
    vmem_need = (2 * (2 * Cin * L * isz + Cout * KKC * wsz + Cout * 4
                      + Cout * L * isz) + KKC * L * isz)
    vmem_limit = int(min(48 * 2**20, max(8 * 2**20, 2 * vmem_need)))

    cost = pl.CostEstimate(
        flops=2 * N * n_rt * L * KKC * Cout,
        bytes_accessed=int(2 * N * n_rt * Cin * L * isz      # both halo views
                           + Cout * KKC * wsz + Cout * 4
                           + N * Cout * n_rt * L * isz),
        transcendentals=0)

    out_flat = pl.pallas_call(
        functools.partial(_conv_fold_kernel, shifts=shifts, cin=Cin, lanes=L),
        out_shape=jax.ShapeDtypeStruct((N, Cout, n_rt * L), out_dtype),
        grid=(N, n_rt),
        in_specs=[
            pl.BlockSpec((None, Cin, L), lambda n, r: (n, 0, r)),      # row block r
            pl.BlockSpec((None, Cin, L), lambda n, r: (n, 0, r + 1)),  # halo block
            pl.BlockSpec((Cout, KKC), lambda n, r: (0, 0)),
            pl.BlockSpec((Cout, 1), lambda n, r: (0, 0)),
        ],
        out_specs=pl.BlockSpec((None, Cout, L), lambda n, r: (n, 0, r)),
        scratch_shapes=[pltpu.VMEM((KKC, L), out_dtype)],
        compiler_params=pltpu.CompilerParams(
            dimension_semantics=("parallel", "parallel"),
            vmem_limit_bytes=vmem_limit),
        cost_estimate=cost,
    )(x_flat, x_flat, w_mat, b_mat)

    # drop wrapped columns (ow >= Wo) and padded rows; already NCHW.
    return out_flat.reshape(N, Cout, n_rt * R, W)[:, :, :Ho, :Wo]


if __name__ == "__main__":
    # Module config: Conv2d(in_channels=4, out_channels=8, kernel_size=3, padding=0)
    in_channels, out_channels, kernel_size, padding = 4, 8, 3, 0
    N, H, W = 2, 16, 16

    key = jax.random.PRNGKey(0)
    kx, kw, kb = jax.random.split(key, 3)

    x = jax.random.normal(kx, (N, in_channels, H, W), dtype=jnp.float32)

    # Deterministic init mirroring nn.Conv2d's default uniform(-1/sqrt(fan_in), ...)
    fan_in = in_channels * kernel_size * kernel_size
    bound = 1.0 / math.sqrt(fan_in)
    weight = jax.random.uniform(
        kw, (out_channels, in_channels, kernel_size, kernel_size),
        minval=-bound, maxval=bound, dtype=jnp.float32)
    bias = jax.random.uniform(
        kb, (out_channels,), minval=-bound, maxval=bound, dtype=jnp.float32)

    # f32 path (row_tile=8 -> grid (2, 2) at these small shapes)
    out = conv2d_pallas(x, weight, bias, padding=padding, row_tile=8)
    out = jax.block_until_ready(out)

    ref = jax.lax.conv_general_dilated(
        x, weight, window_strides=(1, 1),
        padding=((padding, padding), (padding, padding)),
        dimension_numbers=("NCHW", "OIHW", "NCHW")) + bias[None, :, None, None]

    assert out.shape == ref.shape
    assert jnp.allclose(out, ref, atol=1e-4, rtol=1e-4)

    # bf16-operand / f32-accumulate MXU path (v6e / v7x fast path)
    out_bf16 = jax.block_until_ready(
        conv2d_pallas(x, weight, bias, padding=padding, row_tile=8,
                      mxu_dtype=jnp.bfloat16))
    assert jnp.allclose(out_bf16, ref, atol=5e-2, rtol=5e-2)

    print("KERNEL_OK")
</pallas_src>

<mosaic_0001>
module attributes {stable_mosaic.version = 11 : i64} {
  func.func @_conv_fold_kernel(%arg0: i32, %arg1: i32, %arg2: memref<1x4x128xf32, #tpu.memory_space<vmem>>, %arg3: memref<1x4x128xf32, #tpu.memory_space<vmem>>, %arg4: memref<8x36xf32, #tpu.memory_space<vmem>>, %arg5: memref<8x1xf32, #tpu.memory_space<vmem>>, %arg6: memref<1x8x128xf32, #tpu.memory_space<vmem>>, %arg7: memref<36x128xf32, #tpu.memory_space<vmem>>) attributes {dimension_semantics = [#tpu.dimension_semantics<parallel>, #tpu.dimension_semantics<parallel>], iteration_bounds = array<i64: 2, 2>, scalar_prefetch = 0 : i64, scratch_operands = 1 : i64, tpu.core_type = #tpu.core_type<tc>, window_params = [{transform_indices = @transform_0, window_bounds = array<i64: 1, 4, 128>}, {transform_indices = @transform_1, window_bounds = array<i64: 1, 4, 128>}, {pipeline_mode = #tpu.pipeline_mode<synchronous>, transform_indices = @transform_2, window_bounds = array<i64: 8, 36>}, {pipeline_mode = #tpu.pipeline_mode<synchronous>, transform_indices = @transform_3, window_bounds = array<i64: 8, 1>}, {transform_indices = @transform_4, window_bounds = array<i64: 1, 8, 128>}]} {
    %c0 = arith.constant 0 : index
    %c0_0 = arith.constant 0 : index
    %c0_1 = arith.constant 0 : index
    %0 = vector.load %arg2[%c0, %c0_0, %c0_1] : memref<1x4x128xf32, #tpu.memory_space<vmem>>, vector<1x4x128xf32>
    %1 = vector.shape_cast %0 : vector<1x4x128xf32> to vector<4x128xf32>
    %c0_2 = arith.constant 0 : index
    %c0_3 = arith.constant 0 : index
    %2 = vector.load %arg7[%c0_2, %c0_3] : memref<36x128xf32, #tpu.memory_space<vmem>>, vector<4x128xf32>
    tpu.vector_store %arg7[%c0_2, %c0_3], %1 {strides = array<i32>} : memref<36x128xf32, #tpu.memory_space<vmem>>, vector<4x128xf32>,
    %c0_4 = arith.constant 0 : index
    %c0_5 = arith.constant 0 : index
    %c1 = arith.constant 1 : index
    %3 = vector.load %arg2[%c0_4, %c0_5, %c1] : memref<1x4x128xf32, #tpu.memory_space<vmem>>, vector<1x4x127xf32>
    %4 = vector.shape_cast %3 : vector<1x4x127xf32> to vector<4x127xf32>
    %c4 = arith.constant 4 : index
    %c0_6 = arith.constant 0 : index
    %5 = vector.load %arg7[%c4, %c0_6] : memref<36x128xf32, #tpu.memory_space<vmem>>, vector<4x127xf32>
    tpu.vector_store %arg7[%c4, %c0_6], %4 {strides = array<i32>} : memref<36x128xf32, #tpu.memory_space<vmem>>, vector<4x127xf32>,
    %c0_7 = arith.constant 0 : index
    %c0_8 = arith.constant 0 : index
    %c0_9 = arith.constant 0 : index
    %6 = vector.load %arg3[%c0_7, %c0_8, %c0_9] : memref<1x4x128xf32, #tpu.memory_space<vmem>>, vector<1x4x1xf32>
    %7 = vector.shape_cast %6 : vector<1x4x1xf32> to vector<4x1xf32>
    %c4_10 = arith.constant 4 : index
    %c127 = arith.constant 127 : index
    %8 = vector.load %arg7[%c4_10, %c127] : memref<36x128xf32, #tpu.memory_space<vmem>>, vector<4x1xf32>
    tpu.vector_store %arg7[%c4_10, %c127], %7 {strides = array<i32>} : memref<36x128xf32, #tpu.memory_space<vmem>>, vector<4x1xf32>,
    %c0_11 = arith.constant 0 : index
    %c0_12 = arith.constant 0 : index
    %c2 = arith.constant 2 : index
    %9 = vector.load %arg2[%c0_11, %c0_12, %c2] : memref<1x4x128xf32, #tpu.memory_space<vmem>>, vector<1x4x126xf32>
    %10 = vector.shape_cast %9 : vector<1x4x126xf32> to vector<4x126xf32>
    %c8 = arith.constant 8 : index
    %c0_13 = arith.constant 0 : index
    %11 = vector.load %arg7[%c8, %c0_13] : memref<36x128xf32, #tpu.memory_space<vmem>>, vector<4x126xf32>
    tpu.vector_store %arg7[%c8, %c0_13], %10 {strides = array<i32>} : memref<36x128xf32, #tpu.memory_space<vmem>>, vector<4x126xf32>,
    %c0_14 = arith.constant 0 : index
    %c0_15 = arith.constant 0 : index
    %c0_16 = arith.constant 0 : index
    %12 = vector.load %arg3[%c0_14, %c0_15, %c0_16] : memref<1x4x128xf32, #tpu.memory_space<vmem>>, vector<1x4x2xf32>
    %13 = vector.shape_cast %12 : vector<1x4x2xf32> to vector<4x2xf32>
    %c8_17 = arith.constant 8 : index
    %c126 = arith.constant 126 : index
    %14 = vector.load %arg7[%c8_17, %c126] : memref<36x128xf32, #tpu.memory_space<vmem>>, vector<4x2xf32>
    tpu.vector_store %arg7[%c8_17, %c126], %13 {strides = array<i32>} : memref<36x128xf32, #tpu.memory_space<vmem>>, vector<4x2xf32>,
    %c0_18 = arith.constant 0 : index
    %c0_19 = arith.constant 0 : index
    %c16 = arith.constant 16 : index
    %15 = vector.load %arg2[%c0_18, %c0_19, %c16] : memref<1x4x128xf32, #tpu.memory_space<vmem>>, vector<1x4x112xf32>
    %16 = vector.shape_cast %15 : vector<1x4x112xf32> to vector<4x112xf32>
    %c12 = arith.constant 12 : index
    %c0_20 = arith.constant 0 : index
    %17 = vector.load %arg7[%c12, %c0_20] : memref<36x128xf32, #tpu.memory_space<vmem>>, vector<4x112xf32>
    tpu.vector_store %arg7[%c12, %c0_20], %16 {strides = array<i32>} : memref<36x128xf32, #tpu.memory_space<vmem>>, vector<4x112xf32>,
    %c0_21 = arith.constant 0 : index
    %c0_22 = arith.constant 0 : index
    %c0_23 = arith.constant 0 : index
    %18 = vector.load %arg3[%c0_21, %c0_22, %c0_23] : memref<1x4x128xf32, #tpu.memory_space<vmem>>, vector<1x4x16xf32>
    %19 = vector.shape_cast %18 : vector<1x4x16xf32> to vector<4x16xf32>
    %c12_24 = arith.constant 12 : index
    %c112 = arith.constant 112 : index
    %20 = vector.load %arg7[%c12_24, %c112] : memref<36x128xf32, #tpu.memory_space<vmem>>, vector<4x16xf32>
    tpu.vector_store %arg7[%c12_24, %c112], %19 {strides = array<i32>} : memref<36x128xf32, #tpu.memory_space<vmem>>, vector<4x16xf32>,
    %c0_25 = arith.constant 0 : index
    %c0_26 = arith.constant 0 : index
    %c17 = arith.constant 17 : index
    %21 = vector.load %arg2[%c0_25, %c0_26, %c17] : memref<1x4x128xf32, #tpu.memory_space<vmem>>, vector<1x4x111xf32>
    %22 = vector.shape_cast %21 : vector<1x4x111xf32> to vector<4x111xf32>
    %c16_27 = arith.constant 16 : index
    %c0_28 = arith.constant 0 : index
    %23 = vector.load %arg7[%c16_27, %c0_28] : memref<36x128xf32, #tpu.memory_space<vmem>>, vector<4x111xf32>
    tpu.vector_store %arg7[%c16_27, %c0_28], %22 {strides = array<i32>} : memref<36x128xf32, #tpu.memory_space<vmem>>, vector<4x111xf32>,
    %c0_29 = arith.constant 0 : index
    %c0_30 = arith.constant 0 : index
    %c0_31 = arith.constant 0 : index
    %24 = vector.load %arg3[%c0_29, %c0_30, %c0_31] : memref<1x4x128xf32, #tpu.memory_space<vmem>>, vector<1x4x17xf32>
    %25 = vector.shape_cast %24 : vector<1x4x17xf32> to vector<4x17xf32>
    %c16_32 = arith.constant 16 : index
    %c111 = arith.constant 111 : index
    %26 = vector.load %arg7[%c16_32, %c111] : memref<36x128xf32, #tpu.memory_space<vmem>>, vector<4x17xf32>
    tpu.vector_store %arg7[%c16_32, %c111], %25 {strides = array<i32>} : memref<36x128xf32, #tpu.memory_space<vmem>>, vector<4x17xf32>,
    %c0_33 = arith.constant 0 : index
    %c0_34 = arith.constant 0 : index
    %c18 = arith.constant 18 : index
    %27 = vector.load %arg2[%c0_33, %c0_34, %c18] : memref<1x4x128xf32, #tpu.memory_space<vmem>>, vector<1x4x110xf32>
    %28 = vector.shape_cast %27 : vector<1x4x110xf32> to vector<4x110xf32>
    %c20 = arith.constant 20 : index
    %c0_35 = arith.constant 0 : index
    %29 = vector.load %arg7[%c20, %c0_35] : memref<36x128xf32, #tpu.memory_space<vmem>>, vector<4x110xf32>
    tpu.vector_store %arg7[%c20, %c0_35], %28 {strides = array<i32>} : memref<36x128xf32, #tpu.memory_space<vmem>>, vector<4x110xf32>,
    %c0_36 = arith.constant 0 : index
    %c0_37 = arith.constant 0 : index
    %c0_38 = arith.constant 0 : index
    %30 = vector.load %arg3[%c0_36, %c0_37, %c0_38] : memref<1x4x128xf32, #tpu.memory_space<vmem>>, vector<1x4x18xf32>
    %31 = vector.shape_cast %30 : vector<1x4x18xf32> to vector<4x18xf32>
    %c20_39 = arith.constant 20 : index
    %c110 = arith.constant 110 : index
    %32 = vector.load %arg7[%c20_39, %c110] : memref<36x128xf32, #tpu.memory_space<vmem>>, vector<4x18xf32>
    tpu.vector_store %arg7[%c20_39, %c110], %31 {strides = array<i32>} : memref<36x128xf32, #tpu.memory_space<vmem>>, vector<4x18xf32>,
    %c0_40 = arith.constant 0 : index
    %c0_41 = arith.constant 0 : index
    %c32 = arith.constant 32 : index
    %33 = vector.load %arg2[%c0_40, %c0_41, %c32] : memref<1x4x128xf32, #tpu.memory_space<vmem>>, vector<1x4x96xf32>
    %34 = vector.shape_cast %33 : vector<1x4x96xf32> to vector<4x96xf32>
    %c24 = arith.constant 24 : index
    %c0_42 = arith.constant 0 : index
    %35 = vector.load %arg7[%c24, %c0_42] : memref<36x128xf32, #tpu.memory_space<vmem>>, vector<4x96xf32>
    tpu.vector_store %arg7[%c24, %c0_42], %34 {strides = array<i32>} : memref<36x128xf32, #tpu.memory_space<vmem>>, vector<4x96xf32>,
    %c0_43 = arith.constant 0 : index
    %c0_44 = arith.constant 0 : index
    %c0_45 = arith.constant 0 : index
    %36 = vector.load %arg3[%c0_43, %c0_44, %c0_45] : memref<1x4x128xf32, #tpu.memory_space<vmem>>, vector<1x4x32xf32>
    %37 = vector.shape_cast %36 : vector<1x4x32xf32> to vector<4x32xf32>
    %c24_46 = arith.constant 24 : index
    %c96 = arith.constant 96 : index
    %38 = vector.load %arg7[%c24_46, %c96] : memref<36x128xf32, #tpu.memory_space<vmem>>, vector<4x32xf32>
    tpu.vector_store %arg7[%c24_46, %c96], %37 {strides = array<i32>} : memref<36x128xf32, #tpu.memory_space<vmem>>, vector<4x32xf32>,
    %c0_47 = arith.constant 0 : index
    %c0_48 = arith.constant 0 : index
    %c33 = arith.constant 33 : index
    %39 = vector.load %arg2[%c0_47, %c0_48, %c33] : memref<1x4x128xf32, #tpu.memory_space<vmem>>, vector<1x4x95xf32>
    %40 = vector.shape_cast %39 : vector<1x4x95xf32> to vector<4x95xf32>
    %c28 = arith.constant 28 : index
    %c0_49 = arith.constant 0 : index
    %41 = vector.load %arg7[%c28, %c0_49] : memref<36x128xf32, #tpu.memory_space<vmem>>, vector<4x95xf32>
    tpu.vector_store %arg7[%c28, %c0_49], %40 {strides = array<i32>} : memref<36x128xf32, #tpu.memory_space<vmem>>, vector<4x95xf32>,
    %c0_50 = arith.constant 0 : index
    %c0_51 = arith.constant 0 : index
    %c0_52 = arith.constant 0 : index
    %42 = vector.load %arg3[%c0_50, %c0_51, %c0_52] : memref<1x4x128xf32, #tpu.memory_space<vmem>>, vector<1x4x33xf32>
    %43 = vector.shape_cast %42 : vector<1x4x33xf32> to vector<4x33xf32>
    %c28_53 = arith.constant 28 : index
    %c95 = arith.constant 95 : index
    %44 = vector.load %arg7[%c28_53, %c95] : memref<36x128xf32, #tpu.memory_space<vmem>>, vector<4x33xf32>
    tpu.vector_store %arg7[%c28_53, %c95], %43 {strides = array<i32>} : memref<36x128xf32, #tpu.memory_space<vmem>>, vector<4x33xf32>,
    %c0_54 = arith.constant 0 : index
    %c0_55 = arith.constant 0 : index
    %c34 = arith.constant 34 : index
    %45 = vector.load %arg2[%c0_54, %c0_55, %c34] : memref<1x4x128xf32, #tpu.memory_space<vmem>>, vector<1x4x94xf32>
    %46 = vector.shape_cast %45 : vector<1x4x94xf32> to vector<4x94xf32>
    %c32_56 = arith.constant 32 : index
    %c0_57 = arith.constant 0 : index
    %47 = vector.load %arg7[%c32_56, %c0_57] : memref<36x128xf32, #tpu.memory_space<vmem>>, vector<4x94xf32>
    tpu.vector_store %arg7[%c32_56, %c0_57], %46 {strides = array<i32>} : memref<36x128xf32, #tpu.memory_space<vmem>>, vector<4x94xf32>,
    %c0_58 = arith.constant 0 : index
    %c0_59 = arith.constant 0 : index
    %c0_60 = arith.constant 0 : index
    %48 = vector.load %arg3[%c0_58, %c0_59, %c0_60] : memref<1x4x128xf32, #tpu.memory_space<vmem>>, vector<1x4x34xf32>
    %49 = vector.shape_cast %48 : vector<1x4x34xf32> to vector<4x34xf32>
    %c32_61 = arith.constant 32 : index
    %c94 = arith.constant 94 : index
    %50 = vector.load %arg7[%c32_61, %c94] : memref<36x128xf32, #tpu.memory_space<vmem>>, vector<4x34xf32>
    tpu.vector_store %arg7[%c32_61, %c94], %49 {strides = array<i32>} : memref<36x128xf32, #tpu.memory_space<vmem>>, vector<4x34xf32>,
    %c0_62 = arith.constant 0 : index
    %c0_63 = arith.constant 0 : index
    %51 = vector.load %arg4[%c0_62, %c0_63] : memref<8x36xf32, #tpu.memory_space<vmem>>, vector<8x36xf32>
    %c0_64 = arith.constant 0 : index
    %c0_65 = arith.constant 0 : index
    %52 = vector.load %arg7[%c0_64, %c0_65] : memref<36x128xf32, #tpu.memory_space<vmem>>, vector<36x128xf32>
    %cst = arith.constant dense<0.000000e+00> : vector<8x128xf32>
    %53 = tpu.matmul %51, %52, %cst {dimension_numbers = #tpu.dot_dimension_numbers<[1], [0], [0], [1], [0, 0, 1, 1], [], []>} : vector<8x36xf32>, vector<36x128xf32>, vector<8x128xf32> -> vector<8x128xf32>
    %c0_66 = arith.constant 0 : index
    %c0_67 = arith.constant 0 : index
    %54 = vector.load %arg5[%c0_66, %c0_67] : memref<8x1xf32, #tpu.memory_space<vmem>>, vector<8x1xf32>
    %55 = vector.broadcast %54 : vector<8x1xf32> to vector<8x128xf32>
    %56 = arith.addf %53, %55 : vector<8x128xf32>
    %c0_68 = arith.constant 0 : index
    %c0_69 = arith.constant 0 : index
    %c0_70 = arith.constant 0 : index
    %57 = vector.load %arg6[%c0_68, %c0_69, %c0_70] : memref<1x8x128xf32, #tpu.memory_space<vmem>>, vector<1x8x128xf32>
    %58 = vector.shape_cast %57 : vector<1x8x128xf32> to vector<8x128xf32>
    %59 = vector.shape_cast %56 : vector<8x128xf32> to vector<1x8x128xf32>
    tpu.vector_store %arg6[%c0_68, %c0_69, %c0_70], %59 {strides = array<i32>} : memref<1x8x128xf32, #tpu.memory_space<vmem>>, vector<1x8x128xf32>,
    return
  }
  func.func @transform_0(%arg0: i32, %arg1: i32) -> (i32, i32, i32) {
    %c0_i32 = arith.constant 0 : i32
    %c0_i32_0 = arith.constant 0 : i32
    return %arg0, %c0_i32, %arg1 : i32, i32, i32
  }
  func.func @transform_1(%arg0: i32, %arg1: i32) -> (i32, i32, i32) {
    %c1_i32 = arith.constant 1 : i32
    %0 = arith.addi %arg1, %c1_i32 : i32
    %c0_i32 = arith.constant 0 : i32
    %c0_i32_0 = arith.constant 0 : i32
    return %arg0, %c0_i32, %0 : i32, i32, i32
  }
  func.func @transform_2(%arg0: i32, %arg1: i32) -> (i32, i32) {
    %c0_i32 = arith.constant 0 : i32
    %c0_i32_0 = arith.constant 0 : i32
    %c0_i32_1 = arith.constant 0 : i32
    return %c0_i32, %c0_i32_0 : i32, i32
  }
  func.func @transform_3(%arg0: i32, %arg1: i32) -> (i32, i32) {
    %c0_i32 = arith.constant 0 : i32
    %c0_i32_0 = arith.constant 0 : i32
    %c0_i32_1 = arith.constant 0 : i32
    return %c0_i32, %c0_i32_0 : i32, i32
  }
  func.func @transform_4(%arg0: i32, %arg1: i32) -> (i32, i32, i32) {
    %c0_i32 = arith.constant 0 : i32
    %c0_i32_0 = arith.constant 0 : i32
    return %arg0, %c0_i32, %arg1 : i32, i32, i32
  }
}

</mosaic_0001>

<bundles_post_ra>
// kernel: conv2d_pallas.1
= control target key start
LH: loop header
LB: loop body
LE: loop exit
PB: predicated region body
PF: predicated region fallthrough
CT: control target
= control target key end

     0   :  { %s745_s15 = smov 0   ;;  %s747_s16 = smov 0   ;;  %s841_s0 = inlined_call_operand.vmem [shape: f32[2,4,384], index: 0, kind: input, shape index: {}, may-alias: {0,1}]   ;;  %s842_s1 = inlined_call_operand.vmem [shape: f32[2,4,384], index: 1, kind: input, shape index: {}, may-alias: {0,1}]   ;;  %s843_s2 = inlined_call_operand.vmem [shape: f32[8,36], index: 2, kind: input, shape index: {}]   ;;  %s844_s3 = inlined_call_operand.vmem [shape: f32[8,1], index: 3, kind: input, shape index: {}]   ;;  %s845_s4 = inlined_call_operand.vmem [shape: f32[2,8,256], index: 4, kind: output, shape index: {}]  }
   0x1   :  { %s749_s17 = smov 0   ;;  %s751_s18 = smov 0  }
   0x2   :  { %s753_s19 = smov 0  }
   0x3 LB: > { %s23_s20 = sadd.s32 1, %s698_s17  ;;  %s26_s21 = sadd.s32 1, %s702_s18  ;;  %s706_s19 = sphi %s753_s19, %s14_s19   ;;  %s702_s18 = sphi %s751_s18, %s849_s18   ;;  %s698_s17 = sphi %s749_s17, %s848_s17   ;;  %s694_s16 = sphi %s747_s16, %s847_s16   ;;  %s690_s15 = sphi %s745_s15, %s846_s15  }
   0x4   : > { %p24_p0 = scmp.ge.s32.totalorder %s23_s20, 2  ;;  %p580_p1 = scmp.ge.s32.totalorder %s706_s19, 1 }
   0x5   : > { %p200_p2 = scmp.lt.s32.totalorder %s706_s19, 5 }
   0x6   : > { %s851_s20 = smov (%p24_p0, %s23_s20), 0  ;;  %s853_s21 = smov (!%p24_p0, %s26_s21), %s702_s18 }
   0x7   : > { %p201_p3 = pnand %p580_p1, %p200_p2  ;;  %p28_p4 = scmp.ge.s32.totalorder %s853_s21, 2 }
   0x8   : > { %p241_p5 = scmp.lt.s32.totalorder (!%p201_p3), %s694_s16, 1  ;;  %p243_p6 = scmp.lt.s32.totalorder (!%p201_p3), %s690_s15, 2  ;;  %v711_v7 = vmov (!%p201_p3), 0.0|0.0   ;;  %vm716_vm0 = vmmov (!%p201_p3), 0   ;;  %v717_v18 = vmov (!%p201_p3), 0.0   ;;  %v719_v19 = vmov (!%p201_p3), 0  }
   0x9   : > { %s855_s21 = smov (%p28_p4, %s853_s21), 0  ;;  %204 = sbr.rel (%p201_p3) target bundleno = 394 (0x18a), region = 36 }
   0xa   : > { %s249_s24 = sadd.s32 (!%p201_p3), 1, %s690_s15  ;;  %s708_s30 = smov (!%p201_p3), 112   ;;  %608 = vmatprep.subr.bf16.mxu0 (!%p201_p3), %v711_v7  ;;  %605 = vmatprep.mubr.msk.f32.mxu0 (!%p201_p3), %vm716_vm0, %v717_v18  ;;  %v387_v20 = vld [vmem:[%s844_s3] sm:$0xff] (!%p201_p3)  ;;  %vm302_vm1 = vcmask (!%p201_p3), 912384   ;;  %vm274_vm2 = vcmask (!%p201_p3), 1035264   ;;  %vm288_vm3 = vcmask (!%p201_p3), 1027072  }
   0xb   : > { %p252_p7 = scmp.lt.s32.totalorder (!%p201_p3), %s249_s24, 2  ;;  %s709_s5 = smov (!%p201_p3), 127   ;;  %667 = vset.pattern.permute.xlu0 (!%p201_p3), %v719_v19  ;;  %vm281_vm4 = vcmask (!%p201_p3), 1044472   ;;  %vm295_vm5 = vcmask (!%p201_p3), 1044464   ;;  %vm309_vm6 = vcmask (!%p201_p3), 1044352   ;;  %vm316_vm7 = vcmask (!%p201_p3), 904192  }
   0xc   : > { %s710_s11 = smov (!%p201_p3), 126   ;;  %s712_s12 = smov (!%p201_p3), 111   ;;  %vm330_vm8 = vcmask (!%p201_p3), 896000   ;;  %vm344_vm9 = vcmask (!%p201_p3), 781312   ;;  %vm358_vm10 = vcmask (!%p201_p3), 773120   ;;  %vm323_vm11 = vcmask (!%p201_p3), 1044344  }
   0xd   : > { %s713_s13 = smov (!%p201_p3), 110   ;;  %s714_s14 = smov (!%p201_p3), 96   ;;  %vm337_vm12 = vcmask (!%p201_p3), 1044336   ;;  %vm351_vm13 = vcmask (!%p201_p3), 1044224   ;;  %vm365_vm14 = vcmask (!%p201_p3), 1044216   ;;  %vm372_vm15 = vcmask (!%p201_p3), 764928  }
   0xe   : > { %vm379_vm0 = vcmask (!%p201_p3), 1044208   ;;  %v381_v44 = vld [vmem:[%s843_s2] sm:$0xff] (!%p201_p3)  ;;  %p261_p8 = scmp.lt.s32.totalorder (!%p201_p3), %s690_s15, 1 }
  0x10   : > { %s857_s16 = smov (!%p241_p5, %s694_s16), 1  ;;  %s859_s24 = smov (!%p252_p7, %s249_s24), 2 }
  0x11   : > { %s244_s22 = scalar_select %p243_p6, %s690_s15, 2 }
  0x12   : > { %s614_s23 = smul.u32 3, %s857_s16  ;;  %s861_s15 = smov (!%p261_p8, %s690_s15), 1 }
  0x13   : > { %s583_s28 = sshll.u32 %s857_s16, 1 }
  0x14   : > { %s246_s25 = sadd.s32 %s614_s23, %s244_s22  ;;  %s255_s6 = sadd.s32 %s614_s23, %s859_s24 }
  0x15   : > { %s581_s26 = sshll.u32 %s246_s25, 2  ;;  %s582_s7 = sshll.u32 %s255_s6, 2 }
  0x16   : > { %s786_s29 = scalar_lea.vmem %s841_s0, %s581_s26  ;;  %s795_s10 = scalar_lea.vmem %s842_s1, %s582_s7 }
  0x17   : > { %v297_v0 = vld [vmem:[%s786_s29] sm:$0xf]  ;;  %s715_s22 = smov 95   ;;  %s718_s23 = smov 94  }
  0x18   : > { %v269_v1 = vld [vmem:[%s786_s29] sm:$0xf]  ;;  %299 = vrot.lane.b32.xlu1 %v297_v0, %s708_s30 }
  0x19   : > { %271 = vrot.lane.b32.xlu0 %v269_v1, %s709_s5  ;;  %v283_v2 = vld [vmem:[%s786_s29] sm:$0xf] }
  0x1a   : > { %v267_v3 = vld [vmem:[%s786_s29] sm:$0xf] }
  0x1b   : > { %268 = vst [vmem:[#allocation2] sm:$0xf] %v267_v3  ;;  %v276_v4 = vld [vmem:[%s795_s10] sm:$0xf] }
  0x1c   : > { %278 = vrot.lane.b32.xlu1 %v276_v4, %s709_s5  ;;  %v290_v5 = vld [vmem:[%s795_s10] sm:$0xf] }
  0x1d   : > { %285 = vrot.lane.b32.xlu0 %v283_v2, %s710_s11  ;;  %v304_v6 = vld [vmem:[%s795_s10] sm:$0xf] }
  0x1e   : > { %v311_v8 = vld [vmem:[%s786_s29] sm:$0xf] }
  0x1f   : > { %v325_v9 = vld [vmem:[%s786_s29] sm:$0xf] }
  0x20   : > { %306 = vrot.lane.b32.xlu1 %v304_v6, %s708_s30  ;;  %v339_v10 = vld [vmem:[%s786_s29] sm:$0xf] }
  0x21   : > { %292 = vrot.lane.b32.xlu0 %v290_v5, %s710_s11  ;;  %v353_v11 = vld [vmem:[%s786_s29] sm:$0xf] }
  0x22   : > { %v318_v12 = vld [vmem:[%s795_s10] sm:$0xf] }
  0x23   : > { %v332_v13 = vld [vmem:[%s795_s10] sm:$0xf] }
  0x24   : > { %327 = vrot.lane.b32.xlu1 %v325_v9, %s713_s13  ;;  %v346_v14 = vld [vmem:[%s795_s10] sm:$0xf] }
  0x25   : > { %313 = vrot.lane.b32.xlu0 %v311_v8, %s712_s12  ;;  %v360_v15 = vld [vmem:[%s795_s10] sm:$0xf] }
  0x26   : > { %v367_v16 = vld [vmem:[%s786_s29] sm:$0xf]  ;;  %s264_s29 = sadd.s32 %s583_s28, %s861_s15 }
  0x27   : > { %v374_v17 = vld [vmem:[%s795_s10] sm:$0xf]  ;;  %s584_s30 = sshll.u32 %s264_s29, 3 }
  0x28   : > { %355 = vrot.lane.b32.xlu1 %v353_v11, %s715_s22  ;;  %s266_s7 = scalar_lea.vmem %s845_s4, %s584_s30 }
  0x29   : > { %341 = vrot.lane.b32.xlu0 %v339_v10, %s714_s14 }
  0x2c   : > { %334 = vrot.lane.b32.xlu1 %v332_v13, %s713_s13 }
  0x2d   : > { %320 = vrot.lane.b32.xlu0 %v318_v12, %s712_s12 }
  0x30   : > { %362 = vrot.lane.b32.xlu1 %v360_v15, %s715_s22 }
  0x31   : > { %348 = vrot.lane.b32.xlu0 %v346_v14, %s714_s14 }
  0x34   : > { %376 = vrot.lane.b32.xlu1 %v374_v17, %s718_s23 }
  0x35   : > { %369 = vrot.lane.b32.xlu0 %v367_v16, %s718_s23 }
  0x39   : > { %390 = vperm.xlu0 %667, %v387_v20  }
  0x8a   : > { %v300_v21 = vpop.permute.xlu1 %299 }
  0x8b   : > { %v272_v22 = vpop.permute.xlu0 %271  ;;  %303 = vst.msk [vmem:[#allocation2 + $0xc] sm:$0xf] %vm302_vm1, %v300_v21  ;;  %vm397_vm1 = vcmask 1043456  }
  0x8c   : > { %275 = vst.msk [vmem:[#allocation2 + $0x4] sm:$0xf] %vm274_vm2, %v272_v22  ;;  %vm393_vm2 = vcmask 293888  }
  0x8e   : > { %v279_v24 = vpop.permute.xlu1 %278 }
  0x8f   : > { %v286_v23 = vpop.permute.xlu0 %285  ;;  %282 = vst.msk [vmem:[#allocation2 + $0x4] sm:$0xf] %vm281_vm4, %v279_v24 }
  0x90   : > { %289 = vst.msk [vmem:[#allocation2 + $0x8] sm:$0xf] %vm288_vm3, %v286_v23 }
  0x92   : > { %v307_v26 = vpop.permute.xlu1 %306 }
  0x93   : > { %v293_v25 = vpop.permute.xlu0 %292  ;;  %310 = vst.msk [vmem:[#allocation2 + $0xc] sm:$0xf] %vm309_vm6, %v307_v26 }
  0x94   : > { %296 = vst.msk [vmem:[#allocation2 + $0x8] sm:$0xf] %vm295_vm5, %v293_v25 }
  0x96   : > { %v328_v28 = vpop.permute.xlu1 %327  ;;  %v382_v31 = vld [vmem:[#allocation2] sm:$0xff] }
  0x97   : > { %v314_v27 = vpop.permute.xlu0 %313  ;;  %331 = vst.msk [vmem:[#allocation2 + $0x14] sm:$0xf] %vm330_vm8, %v328_v28 }
  0x98   : > { %317 = vst.msk [vmem:[#allocation2 + $0x10] sm:$0xf] %vm316_vm7, %v314_v27 }
  0x9a   : > { %v356_v30 = vpop.permute.xlu1 %355 }
  0x9b   : > { %v342_v29 = vpop.permute.xlu0 %341  ;;  %v383_v32 = vld [vmem:[#allocation2 + $0x8] sm:$0xff]  ;;  %359 = vst.msk [vmem:[#allocation2 + $0x1c] sm:$0xf] %vm358_vm10, %v356_v30 }
  0x9c   : > { %345 = vst.msk [vmem:[#allocation2 + $0x18] sm:$0xf] %vm344_vm9, %v342_v29  ;;  %v609_v33 = vpack.c.bf16 %v383_v32, %v382_v31 }
  0x9e   : > { %610 = vmatpush3.bf16.msra.mxu0 %v609_v33  ;;  %v335_v35 = vpop.permute.xlu1 %334 }
  0x9f   : > { %v321_v34 = vpop.permute.xlu0 %320  ;;  %611 = vmatprep.subr.bf16.mxu0 %v711_v7  ;;  %338 = vst.msk [vmem:[#allocation2 + $0x14] sm:$0xf] %vm337_vm12, %v335_v35 }
  0xa0   : > { %324 = vst.msk [vmem:[#allocation2 + $0x10] sm:$0xf] %vm323_vm11, %v321_v34 }
  0xa2   : > { %v363_v37 = vpop.permute.xlu1 %362 }
  0xa3   : > { %v349_v36 = vpop.permute.xlu0 %348  ;;  %366 = vst.msk [vmem:[#allocation2 + $0x1c] sm:$0xf] %vm365_vm14, %v363_v37 }
  0xa4   : > { %352 = vst.msk [vmem:[#allocation2 + $0x18] sm:$0xf] %vm351_vm13, %v349_v36 }
  0xa6   : > { %v377_v39 = vpop.permute.xlu1 %376 }
  0xa7   : > { %v370_v38 = vpop.permute.xlu0 %369  ;;  %v384_v40 = vld [vmem:[#allocation2 + $0x10] sm:$0xff] }
  0xa8   : > { %373 = vst.msk [vmem:[#allocation2 + $0x20] sm:$0xf] %vm372_vm15, %v370_v38 }
  0xa9   : > { %380 = vst.msk [vmem:[#allocation2 + $0x20] sm:$0xf] %vm379_vm0, %v377_v39 }
  0xab   : > { %v385_v41 = vld [vmem:[#allocation2 + $0x18] sm:$0xff] }
  0xac   : > { %v612_v42 = vpack.c.bf16 %v385_v41, %v384_v40 }
  0xae   : > { %613 = vmatpush3.bf16.msra.mxu0 %v612_v42 }
  0xaf   : > { %603 = vmatprep.subr.mxu0 %v717_v18 }
  0xb0   : > { %v386_v43 = vld [vmem:[#allocation2 + $0x20] sm:$0xf] }
  0xb2   : > { %604 = vmatpush3.msk.msra.mxu0 %vm397_vm1, %v386_v43 }
  0xb3   : > { %606 = vmatmul.mubr.msk.f32.vlgmr.msra.gmra.mrb[0].mxu0 %vm393_vm2, %v381_v44 }
  0xb8   : > { %v391_v45 = vpop.permute.xlu0 %390 }
 0x186   : > { %v467_v46 = vpop.f32.mrb[0].mxu0 }
 0x187   : > { %v468_v47 = vadd.f32 %v467_v46, %v391_v45  ;;  %v607_v48 = vpop.f32.mrb[1].mxu0 }
 0x189   : > { %471 = vst [vmem:[%s266_s7] sm:$0xff] %v468_v47 }
 0x18a PF: > { %s14_s19 = sadd.s32 1, %s706_s19   ;;  %s846_s15 = smov %s698_s17 }
 0x18b   : > { %p11_p9 = scmp.ge.s32.totalorder %s14_s19, 6   ;;  %s847_s16 = smov %s702_s18 }
 0x18c   : > { %s848_s17 = smov %s851_s20  ;;  %s849_s18 = smov %s855_s21 }
 0x18d   :  { %13 = sbr.rel (!%p11_p9) target bundleno = 3 (0x3), region = 69 }

</bundles_post_ra>
